<compile_context>
chip_gen: v7x
topology: tpu7x:2x2x1
jax: 0.10.0
libtpu: 0.0.40
codegen_flags: <defaults>
</compile_context>

<pallas_src>
import math

import jax
import jax.numpy as jnp
from jax import lax
from jax.experimental import pallas as pl
from jax.experimental.pallas import tpu as pltpu


_INV_SQRT2 = 1.0 / math.sqrt(2.0)


def _gelu_exact(x):
    # F.gelu default (exact, erf-based), computed in float32 (EUP / VPU work
    # hides under the MXU for realistic d_model).
    return 0.5 * x * (1.0 + lax.erf(x * _INV_SQRT2))


def mlp_kernel(x_ref, w_fc_ref, b_fc_ref, w_proj_ref, b_proj_ref, o_ref):
    # Grid: (row tiles i, hidden tiles j).  j is the reduction ("arbitrary",
    # last) axis; the output block index is constant across j, so the f32
    # output block stays VMEM-resident and doubles as the accumulator.
    j = pl.program_id(1)

    @pl.when(j == 0)
    def _():
        # Hoisted output bias: initialize the resident output block with
        # b_proj once per row tile (no separate accumulator scratch).
        o_ref[...] = jnp.broadcast_to(
            b_proj_ref[...].astype(o_ref.dtype), o_ref.shape
        )

    # (tm, d_model) @ (d_model, tn) on the MXU, bf16 inputs, f32 accumulation.
    h = jnp.dot(x_ref[...], w_fc_ref[...], preferred_element_type=jnp.float32)
    h = _gelu_exact(h + b_fc_ref[...].astype(jnp.float32))

    # (tm, tn) @ (tn, d_model), accumulated directly into the output block.
    o_ref[...] += jnp.dot(
        h.astype(w_proj_ref.dtype), w_proj_ref[...],
        preferred_element_type=jnp.float32,
    )
    # TODO(synk): dropout with p>0 (training mode) would need pltpu PRNG;
    # here dropout=0.0 -> identity, matching eval semantics exactly.


def _round_up(x, m):
    return (x + m - 1) // m * m


def _vmem_capacity_bytes():
    """Generation-aware VMEM capacity (64 MiB v7x, 128 MiB v5e/v6e)."""
    try:
        info = pltpu.get_tpu_info()
        cap = getattr(info, "vmem_capacity_bytes", None)
        if cap:
            return int(cap)
    except Exception:
        pass
    return 64 * 1024 * 1024  # conservative fallback (fits every generation)


def _pick_tm(M, target):
    """Largest 8-multiple <= target with <=12.5% padded-row waste."""
    tm_max = min(target, _round_up(M, 8))
    for cand in range(tm_max, 7, -8):
        m_pad = _round_up(M, cand)
        if (m_pad - M) * 8 <= m_pad:
            return cand
    return 8


def _vmem_use(tm, tn, d_model, nx, comp_isz, out_isz):
    """Rough per-step VMEM footprint (default double-buffered blocks)."""
    buf = 2
    use = buf * tm * d_model * comp_isz          # x row tile
    use += buf * d_model * tn * comp_isz         # W_fc slab
    use += buf * tn * d_model * comp_isz         # W_proj slab
    use += buf * (tn + d_model) * 4              # f32 bias tiles
    use += buf * tm * d_model * out_isz          # f32 output/accumulator tile
    use += tm * tn * (4 + comp_isz)              # gelu intermediate + bf16 copy
    return use


def mlp_forward(x, w_fc, b_fc, w_proj, b_proj, *, tm=512,
                compute_dtype=jnp.bfloat16):
    """x: (B, T, d_model) -> (B, T, d_model). f32 accumulation, bf16 matmuls."""
    orig_dtype = x.dtype
    B, T, d_model = x.shape
    nx = w_fc.shape[1]
    M = B * T

    comp_isz = jnp.dtype(compute_dtype).itemsize
    out_isz = 4  # output block is the f32 accumulator

    vmem_cap = _vmem_capacity_bytes()
    budget = int(vmem_cap * 0.70)

    # If the weight slabs cannot be fully resident, a bigger row tile is the
    # main lever for arithmetic intensity; try 1024 when there are enough rows.
    tm_target = tm
    resident_w_bytes = 2 * 2 * d_model * nx * comp_isz  # both weights, 2 bufs
    if resident_w_bytes > budget // 2 and M >= 1024:
        tm_target = max(tm_target, 1024)

    tm = _pick_tm(M, tm_target)

    # v7x has 2 TensorCores: keep at least 2 tiles on the "parallel" row axis
    # so both cores get work (harmless on single-TC v5e/v6e).
    if M > 8 and _round_up(M, tm) // tm < 2:
        tm = _round_up((M + 1) // 2, 8)

    # Hidden-dim tile: prefer tn = nx (weights VMEM-resident, fetched from HBM
    # exactly once for the whole grid); otherwise the largest 128-multiple
    # divisor of nx whose slabs fit the budget.  Shrink tm if nothing fits.
    divisors = [d for d in range(128, nx, 128) if nx % d == 0]
    tn_candidates = [nx] + sorted(divisors, reverse=True)

    tn = None
    while True:
        for cand in tn_candidates:
            if _vmem_use(tm, cand, d_model, nx, comp_isz, out_isz) <= budget:
                tn = cand
                break
        if tn is not None or tm <= 8:
            break
        tm = max(8, _round_up(tm // 2, 8))
    if tn is None:
        tn = tn_candidates[-1]  # last resort; let the compiler spill

    M_pad = _round_up(M, tm)
    grid = (M_pad // tm, nx // tn)

    # Cast activations / weights to bf16 once in the wrapper (not per step).
    x2d = x.reshape(M, d_model).astype(compute_dtype)
    if M_pad != M:
        x2d = jnp.pad(x2d, ((0, M_pad - M), (0, 0)))
    w_fc_c = w_fc.astype(compute_dtype)
    w_proj_c = w_proj.astype(compute_dtype)
    b_fc2 = b_fc.reshape(1, nx).astype(jnp.float32)
    b_proj2 = b_proj.reshape(1, d_model).astype(jnp.float32)

    # Weights are streamed once total when resident (tn == nx), otherwise once
    # per row tile.
    weight_bytes = 2 * d_model * nx * comp_isz
    weight_streams = 1 if tn == nx else grid[0]
    cost = pl.CostEstimate(
        flops=4 * M_pad * d_model * nx,          # two matmuls (padded rows)
        transcendentals=M_pad * nx,              # erf inside GELU
        bytes_accessed=(M_pad * d_model * comp_isz           # x
                        + weight_streams * weight_bytes      # both weights
                        + (nx + d_model) * 4                 # biases
                        + M_pad * d_model * out_isz),        # output
    )

    needed = _vmem_use(tm, tn, d_model, nx, comp_isz, out_isz)
    vmem_limit = int(min(int(vmem_cap * 0.9),
                         max(needed + (16 << 20), 32 << 20)))

    # NOTE: the x row tile and b_proj are constant across the inner j axis;
    # pl.Buffered(1) on them would reclaim a little more VMEM on v7x, left
    # out here to keep the default (safe) pipeline configuration.
    out2d = pl.pallas_call(
        mlp_kernel,
        out_shape=jax.ShapeDtypeStruct((M_pad, d_model), jnp.float32),
        grid_spec=pltpu.PrefetchScalarGridSpec(
            num_scalar_prefetch=0,
            grid=grid,
            in_specs=[
                pl.BlockSpec((tm, d_model), lambda i, j: (i, 0)),   # x row tile
                pl.BlockSpec((d_model, tn), lambda i, j: (0, j)),   # W_fc slab
                pl.BlockSpec((1, tn), lambda i, j: (0, j)),         # b_fc slab
                pl.BlockSpec((tn, d_model), lambda i, j: (j, 0)),   # W_proj slab
                pl.BlockSpec((1, d_model), lambda i, j: (0, 0)),    # b_proj
            ],
            out_specs=pl.BlockSpec((tm, d_model), lambda i, j: (i, 0)),
        ),
        compiler_params=pltpu.CompilerParams(
            dimension_semantics=("parallel", "arbitrary"),
            vmem_limit_bytes=vmem_limit,
        ),
        cost_estimate=cost,
    )(x2d, w_fc_c, b_fc2, w_proj_c, b_proj2)

    if M_pad != M:
        out2d = out2d[:M]
    out = out2d.reshape(B, T, d_model)
    if out.dtype != orig_dtype:
        out = out.astype(orig_dtype)
    return out


def _reference(x, w_fc, b_fc, w_proj, b_proj):
    h = x @ w_fc + b_fc
    h = 0.5 * h * (1.0 + lax.erf(h / jnp.sqrt(2.0)))
    return h @ w_proj + b_proj


if __name__ == "__main__":
    # Small shapes consistent with the module (d_model, nx = 4 * d_model).
    B, T, d_model = 2, 8, 64
    nx = 4 * d_model  # 256

    key = jax.random.PRNGKey(0)
    kx, kw1, kw2 = jax.random.split(key, 3)

    x = jax.random.normal(kx, (B, T, d_model), dtype=jnp.float32)
    # Deterministic init mirroring nn.init.normal_(std=0.02) and zero biases.
    w_fc = 0.02 * jax.random.normal(kw1, (d_model, nx), dtype=jnp.float32)
    b_fc = jnp.zeros((nx,), dtype=jnp.float32)
    w_proj = 0.02 * jax.random.normal(kw2, (nx, d_model), dtype=jnp.float32)
    b_proj = jnp.zeros((d_model,), dtype=jnp.float32)

    out = mlp_forward(x, w_fc, b_fc, w_proj, b_proj)
    out = jax.block_until_ready(out)

    ref = _reference(x, w_fc, b_fc, w_proj, b_proj)
    assert out.shape == (B, T, d_model)
    # bf16 matmul inputs with f32 accumulation -> loosened tolerance vs f32
    # reference (intentional: inference-grade numerics).
    assert jnp.allclose(out, ref, atol=2e-2, rtol=2e-2), "mismatch vs reference"

    print("KERNEL_OK")
</pallas_src>

<mosaic_0001>
module attributes {stable_mosaic.version = 11 : i64} {
  func.func @mlp_kernel(%arg0: i32, %arg1: i32, %arg2: memref<8x64xbf16, #tpu.memory_space<vmem>>, %arg3: memref<64x256xbf16, #tpu.memory_space<vmem>>, %arg4: memref<1x256xf32, #tpu.memory_space<vmem>>, %arg5: memref<256x64xbf16, #tpu.memory_space<vmem>>, %arg6: memref<1x64xf32, #tpu.memory_space<vmem>>, %arg7: memref<8x64xf32, #tpu.memory_space<vmem>>) attributes {dimension_semantics = [#tpu.dimension_semantics<parallel>, #tpu.dimension_semantics<arbitrary>], iteration_bounds = array<i64: 2, 1>, scalar_prefetch = 0 : i64, scratch_operands = 0 : i64, tpu.core_type = #tpu.core_type<tc>, window_params = [{transform_indices = @transform_0, window_bounds = array<i64: 8, 64>}, {transform_indices = @transform_1, window_bounds = array<i64: 64, 256>}, {transform_indices = @transform_2, window_bounds = array<i64: 1, 256>}, {transform_indices = @transform_3, window_bounds = array<i64: 256, 64>}, {pipeline_mode = #tpu.pipeline_mode<synchronous>, transform_indices = @transform_4, window_bounds = array<i64: 1, 64>}, {transform_indices = @transform_5, window_bounds = array<i64: 8, 64>}]} {
    %c0_i32 = arith.constant 0 : i32
    %0 = arith.cmpi eq, %arg1, %c0_i32 : i32
    %1 = arith.extui %0 : i1 to i32
    %c0_i32_0 = arith.constant 0 : i32
    %2 = arith.cmpi ne, %1, %c0_i32_0 : i32
    scf.if %2 {
      %c0_16 = arith.constant 0 : index
      %c0_17 = arith.constant 0 : index
      %23 = vector.load %arg6[%c0_16, %c0_17] : memref<1x64xf32, #tpu.memory_space<vmem>>, vector<1x64xf32>
      %24 = vector.shape_cast %23 : vector<1x64xf32> to vector<1x64xf32>
      %25 = vector.broadcast %24 : vector<1x64xf32> to vector<8x64xf32>
      %c0_18 = arith.constant 0 : index
      %c0_19 = arith.constant 0 : index
      %26 = vector.load %arg7[%c0_18, %c0_19] : memref<8x64xf32, #tpu.memory_space<vmem>>, vector<8x64xf32>
      tpu.vector_store %arg7[%c0_18, %c0_19], %25 {strides = array<i32>} : memref<8x64xf32, #tpu.memory_space<vmem>>, vector<8x64xf32>,
    } else {
    }
    %c0 = arith.constant 0 : index
    %c0_1 = arith.constant 0 : index
    %3 = vector.load %arg2[%c0, %c0_1] : memref<8x64xbf16, #tpu.memory_space<vmem>>, vector<8x64xbf16>
    %c0_2 = arith.constant 0 : index
    %c0_3 = arith.constant 0 : index
    %4 = vector.load %arg3[%c0_2, %c0_3] : memref<64x256xbf16, #tpu.memory_space<vmem>>, vector<64x256xbf16>
    %cst = arith.constant dense<0.000000e+00> : vector<8x256xf32>
    %5 = tpu.matmul %3, %4, %cst {dimension_numbers = #tpu.dot_dimension_numbers<[1], [0], [0], [1], [0, 0, 1, 1], [], []>} : vector<8x64xbf16>, vector<64x256xbf16>, vector<8x256xf32> -> vector<8x256xf32>
    %c0_4 = arith.constant 0 : index
    %c0_5 = arith.constant 0 : index
    %6 = vector.load %arg4[%c0_4, %c0_5] : memref<1x256xf32, #tpu.memory_space<vmem>>, vector<1x256xf32>
    %7 = vector.broadcast %6 : vector<1x256xf32> to vector<8x256xf32>
    %8 = arith.addf %5, %7 : vector<8x256xf32>
    %cst_6 = arith.constant 5.000000e-01 : f32
    %9 = vector.broadcast %cst_6 : f32 to vector<8x256xf32>
    %10 = arith.mulf %9, %8 : vector<8x256xf32>
    %cst_7 = arith.constant 0.707106769 : f32
    %11 = vector.broadcast %cst_7 : f32 to vector<8x256xf32>
    %12 = arith.mulf %8, %11 : vector<8x256xf32>
    %13 = math.erf %12 : vector<8x256xf32>
    %cst_8 = arith.constant 1.000000e+00 : f32
    %14 = vector.broadcast %cst_8 : f32 to vector<8x256xf32>
    %15 = arith.addf %14, %13 : vector<8x256xf32>
    %16 = arith.mulf %10, %15 : vector<8x256xf32>
    %c0_9 = arith.constant 0 : index
    %c0_10 = arith.constant 0 : index
    %17 = vector.load %arg7[%c0_9, %c0_10] : memref<8x64xf32, #tpu.memory_space<vmem>>, vector<8x64xf32>
    %18 = arith.truncf %16 : vector<8x256xf32> to vector<8x256xbf16>
    %c0_11 = arith.constant 0 : index
    %c0_12 = arith.constant 0 : index
    %19 = vector.load %arg5[%c0_11, %c0_12] : memref<256x64xbf16, #tpu.memory_space<vmem>>, vector<256x64xbf16>
    %cst_13 = arith.constant dense<0.000000e+00> : vector<8x64xf32>
    %20 = tpu.matmul %18, %19, %cst_13 {dimension_numbers = #tpu.dot_dimension_numbers<[1], [0], [0], [1], [0, 0, 1, 1], [], []>} : vector<8x256xbf16>, vector<256x64xbf16>, vector<8x64xf32> -> vector<8x64xf32>
    %21 = arith.addf %17, %20 : vector<8x64xf32>
    %c0_14 = arith.constant 0 : index
    %c0_15 = arith.constant 0 : index
    %22 = vector.load %arg7[%c0_14, %c0_15] : memref<8x64xf32, #tpu.memory_space<vmem>>, vector<8x64xf32>
    tpu.vector_store %arg7[%c0_14, %c0_15], %21 {strides = array<i32>} : memref<8x64xf32, #tpu.memory_space<vmem>>, vector<8x64xf32>,
    return
  }
  func.func @transform_0(%arg0: i32, %arg1: i32) -> (i32, i32) {
    %c0_i32 = arith.constant 0 : i32
    %c0_i32_0 = arith.constant 0 : i32
    return %arg0, %c0_i32 : i32, i32
  }
  func.func @transform_1(%arg0: i32, %arg1: i32) -> (i32, i32) {
    %c0_i32 = arith.constant 0 : i32
    %c0_i32_0 = arith.constant 0 : i32
    return %c0_i32, %arg1 : i32, i32
  }
  func.func @transform_2(%arg0: i32, %arg1: i32) -> (i32, i32) {
    %c0_i32 = arith.constant 0 : i32
    %c0_i32_0 = arith.constant 0 : i32
    return %c0_i32, %arg1 : i32, i32
  }
  func.func @transform_3(%arg0: i32, %arg1: i32) -> (i32, i32) {
    %c0_i32 = arith.constant 0 : i32
    %c0_i32_0 = arith.constant 0 : i32
    return %arg1, %c0_i32 : i32, i32
  }
  func.func @transform_4(%arg0: i32, %arg1: i32) -> (i32, i32) {
    %c0_i32 = arith.constant 0 : i32
    %c0_i32_0 = arith.constant 0 : i32
    %c0_i32_1 = arith.constant 0 : i32
    return %c0_i32, %c0_i32_0 : i32, i32
  }
  func.func @transform_5(%arg0: i32, %arg1: i32) -> (i32, i32) {
    %c0_i32 = arith.constant 0 : i32
    %c0_i32_0 = arith.constant 0 : i32
    return %arg0, %c0_i32 : i32, i32
  }
}

</mosaic_0001>

<bundles_post_ra>
// kernel: tpu_custom_call.1
= control target key start
LH: loop header
LB: loop body
LE: loop exit
PB: predicated region body
PF: predicated region fallthrough
CT: control target
= control target key end

     0   :  { %10 = vsyncpa [#allocation3], 0  ;;  %s1176_s0 = inlined_call_operand.vmem [shape: bf16[16,64], index: 0, kind: input, shape index: {}]   ;;  %s1177_s1 = inlined_call_operand.vmem [shape: bf16[64,256], index: 1, kind: input, shape index: {}]   ;;  %s1178_s2 = inlined_call_operand.vmem [shape: f32[1,256], index: 2, kind: input, shape index: {}]   ;;  %s1179_s3 = inlined_call_operand.vmem [shape: bf16[256,64], index: 3, kind: input, shape index: {}]   ;;  %s1180_s4 = inlined_call_operand.vmem [shape: f32[1,64], index: 4, kind: input, shape index: {}]   ;;  %s1181_s5 = inlined_call_operand.hbm [shape: f32[16,64], index: 5, kind: output, shape index: {}]  }
   0x1   :  { %12 = vsyncpa [#allocation3 + $0x1], 0  ;;  %s983_s18 = smov 0   ;;  %s985_s19 = smov 0  }
   0x2   :  { %s987_s20 = smov 0   ;;  %s989_s21 = smov 0  }
   0x3   :  { %s991_s22 = smov 0   ;;  %s993_s23 = smov 0  }
   0x4 LB: > { %s721_s24 = sadd.s32 4294967295, %s949_s23   ;;  %s722_s25 = sadd.s32 4294967294, %s949_s23   ;;  %s949_s23 = sphi %s993_s23, %s18_s23   ;;  %s945_s22 = sphi %s991_s22, %s1188_s22   ;;  %s941_s21 = sphi %s989_s21, %s1187_s21   ;;  %s937_s20 = sphi %s987_s20, %s1186_s20   ;;  %s933_s19 = sphi %s985_s19, %s1185_s19   ;;  %s929_s18 = sphi %s983_s18, %s1184_s18  }
   0x5   : > { %s30_s26 = sadd.s32 1, %s945_s22  ;;  %s162_s27 = sadd.s32 1, %s937_s20 }
   0x6   : > { %p32_p0 = scmp.ge.s32.totalorder %s30_s26, 2  ;;  %p172_p1 = scmp.ne.s32.totalorder %s937_s20, %s933_s19 }
   0x7   : > { %p173_p2 = scmp.eq.s32.totalorder %s721_s24, 1  ;;  %p178_p3 = scmp.ne.s32.totalorder %s933_s19, %s929_s18 }
   0x8   : > { %s1190_s26 = smov (%p32_p0, %s30_s26), 0  ;;  %p179_p5 = scmp.eq.s32.totalorder %s722_s25, 1 }
   0x9   : > { %p1023_p4 = por %p173_p2, %p172_p1  ;;  %s159_s29 = ssub.s32 %s945_s22, %s1190_s26 }
   0xa   : > { %p728_p6 = scmp.ge.s32.totalorder %s949_s23, 1  ;;  %p160_p7 = scmp.eq.s32.totalorder %s159_s29, 0 }
   0xb   : > { %p1030_p8 = por %p179_p5, %p178_p3  ;;  %p233_p9 = scmp.lt.s32.totalorder %s949_s23, 3 }
   0xc   : > { %s1036_s6 = scalar_select %p160_p7, %s937_s20, %s162_s27  }
   0xd   : > { %p234_p10 = pnand %p728_p6, %p233_p9 }
   0xe   : > { %v839_v0 = vld [vmem:[%s1177_s1 + $0x4] ss:$8 sps:$4 sm:$0xff] (!%p234_p10)   ;;  %p274_p11 = scmp.lt.s32.totalorder (!%p234_p10), %s941_s21, 1  ;;  %v841_v1 = vld [vmem:[%s1177_s1] ss:$8 sps:$4 sm:$0xff] (!%p234_p10)   ;;  %v951_v2 = vmov (!%p234_p10), 0   ;;  %v320_v26 = vlaneseq (!%p234_p10) }
   0xf   : > { %237 = sbr.rel (%p234_p10) target bundleno = 497 (0x1f1), region = 40  ;;  %406 = vmatprep.mubr.bf16.mxu0 (!%p234_p10), %v951_v2  ;;  %374 = vmatprep.subr.bf16.mxu0 (!%p234_p10), %v839_v0  ;;  %v842_v3 = vld [vmem:[%s1177_s1 + $0x14] ss:$8 sps:$4 sm:$0xff] (!%p234_p10)   ;;  %v844_v4 = vld [vmem:[%s1177_s1 + $0x10] ss:$8 sps:$4 sm:$0xff] (!%p234_p10)   ;;  %v851_v8 = vld [vmem:[%s1179_s3 + $0x40] sm:$0xff] (!%p234_p10)  }
  0x10   : > { %375 = vmatpush1.bf16.msra.mxu0 (!%p234_p10), %v841_v1  ;;  %v845_v5 = vld [vmem:[%s1177_s1 + $0x24] ss:$8 sps:$4 sm:$0xff] (!%p234_p10)   ;;  %v847_v6 = vld [vmem:[%s1177_s1 + $0x20] ss:$8 sps:$4 sm:$0xff] (!%p234_p10)   ;;  %v848_v7 = vld [vmem:[%s1177_s1 + $0x34] ss:$8 sps:$4 sm:$0xff] (!%p234_p10)   ;;  %761 = vmatprep.subr.bf16.mxu1 (!%p234_p10), %v851_v8 }
  0x11   : > { %376 = vmatprep.subr.bf16.mxu0 (!%p234_p10), %v842_v3  ;;  %v852_v9 = vld [vmem:[%s1179_s3] sm:$0xff] (!%p234_p10)   ;;  %v853_v10 = vld [vmem:[%s1179_s3 + $0x48] sm:$0xff] (!%p234_p10)   ;;  %v850_v11 = vld [vmem:[%s1177_s1 + $0x30] ss:$8 sps:$4 sm:$0xff] (!%p234_p10)   ;;  %vm307_vm0 = vcmask (!%p234_p10), 523264   ;;  %v321_v27 = vshrl.u32 (!%p234_p10), %v320_v26, 7 }
  0x12   : > { %762 = vmatpush3.bf16.msra.mxu1 (!%p234_p10), %v852_v9  ;;  %v854_v12 = vld [vmem:[%s1179_s3 + $0x8] sm:$0xff] (!%p234_p10)   ;;  %v855_v14 = vld [vmem:[%s1179_s3 + $0x50] sm:$0xff] (!%p234_p10)   ;;  %v857_v16 = vld [vmem:[%s1179_s3 + $0x58] sm:$0xff] (!%p234_p10)   ;;  %s271_s24 = sand.u32 (!%p234_p10), 1, %s933_s19   ;;  %s758_s7 = sshll.u32 (!%p234_p10), %s941_s21, 7 }
  0x13   : > { %763 = vmatprep.subr.bf16.mxu1 (!%p234_p10), %v853_v10  ;;  %v856_v15 = vld [vmem:[%s1179_s3 + $0x10] sm:$0xff] (!%p234_p10)   ;;  %v858_v17 = vld [vmem:[%s1179_s3 + $0x18] sm:$0xff] (!%p234_p10)   ;;  %v859_v18 = vld [vmem:[%s1179_s3 + $0x60] sm:$0xff] (!%p234_p10)   ;;  %v322_v28 = vsub.s32 (!%p234_p10), 0, %v321_v27  ;;  %v326_v30 = vsub.s32 (!%p234_p10), 1, %v321_v27  ;;  %s599_s12 = scalar_lea.sflag (!%p234_p10), [#allocation3], %s271_s24 }
  0x14   : > { %377 = vmatpush1.bf16.msra.mxu0 (!%p234_p10), %v844_v4  ;;  %v860_v19 = vld [vmem:[%s1179_s3 + $0x20] sm:$0xff] (!%p234_p10)   ;;  %v861_v20 = vld [vmem:[%s1179_s3 + $0x68] sm:$0xff] (!%p234_p10)   ;;  %v863_v22 = vld [vmem:[%s1179_s3 + $0x70] sm:$0xff] (!%p234_p10)  }
  0x15   : > { %378 = vmatprep.subr.bf16.mxu0 (!%p234_p10), %v845_v5  ;;  %v862_v21 = vld [vmem:[%s1179_s3 + $0x28] sm:$0xff] (!%p234_p10)   ;;  %v864_v23 = vld [vmem:[%s1179_s3 + $0x30] sm:$0xff] (!%p234_p10)   ;;  %v865_v24 = vld [vmem:[%s1179_s3 + $0x78] sm:$0xff] (!%p234_p10)  }
  0x16   : > { %s275_s15 = scalar_select %p274_p11, %s941_s21, 1  ;;  %764 = vmatpush3.bf16.msra.mxu1 %v854_v12  ;;  %v866_v25 = vld [vmem:[%s1179_s3 + $0x38] sm:$0xff]   ;;  %v318_v29 = vld [vmem:[%s1178_s2] sm:$0x3] }
  0x17   : > { %765 = vmatprep.subr.bf16.mxu1 %v855_v14  ;;  %v323_v31 = vrot.slane %v318_v29, %v322_v28  ;;  %v327_v32 = vrot.slane %v318_v29, %v326_v30  ;;  %v731_v51 = vld [vmem:[%s1180_s4] ss:$0 sm:$0xff]  ;;  %s952_s21 = smov [#allocation2]  }
  0x18   : > { %s730_s9 = sshll.u32 %s275_s15, 2  ;;  %379 = vmatpush1.bf16.msra.mxu0 %v847_v6  ;;  %s729_s15 = sshll.u32 %s271_s24, 3 }
  0x19   : > { %s277_s27 = scalar_lea.vmem %s1176_s0, %s730_s9  ;;  %380 = vmatprep.subr.bf16.mxu0 %v848_v7  ;;  %s273_s29 = scalar_lea.vmem [#allocation2], %s729_s15 }
  0x1a   : > { %v309_v13 = vld [vmem:[%s277_s27] sm:$0xf]  ;;  %766 = vmatpush3.bf16.msra.mxu1 %v856_v15  ;;  %308 = vst.msk [vmem:[%s273_s29] sm:$0xff] %vm307_vm0, %v731_v51  ;;  %s612_s8 = sshll.u32 %s273_s29, 4  ;;  %s1128_s9 = scalar_lea.hbm %s1181_s5, %s758_s7  ;;  %s1130_s8 = int_to_ptr.vmem [resolvable:$true] %s612_s8 }
  0x1b   : > { %767 = vmatprep.subr.bf16.mxu1 %v857_v16  ;;  %s871_s13 = scalar_lea.vmem %s1130_s8, 128  ;;  %s875_s14 = sshll.u32 %s952_s21, 4  ;;  %s876_s14 = int_to_ptr.vmem [resolvable:$false] %s875_s14 }
  0x1c   : > { %381 = vmatpush1.bf16.msra.mxu0 %v850_v11  ;;  %p872_p12 = scmp.ne.s32.totalorder %s1130_s8, %s871_s13  ;;  %s877_s16 = scalar_lea.vmem %s876_s14, 256 }
  0x1d   : > { %p878_p1 = scmp.lt.s32.totalorder %s1130_s8, %s876_s14  ;;  %p879_p2 = scmp.lt.s32.totalorder %s877_s16, %s871_s13 }
  0x1e   : > { %768 = vmatpush3.bf16.msra.mxu1 %v858_v17  ;;  %p873_p13 = pnand %p872_p12, %p1023_p4 }
  0x1f   : > { %740 = vmatmul.mubr.msk.bf16.vlgmr.msra.gmra.mrb[0].mxu0 %vm307_vm0, %v309_v13  ;;  %769 = vmatprep.subr.bf16.mxu1 %v859_v18  ;;  %p880_p3 = por %p879_p2, %p878_p1 }
  0x20   : > { %p874_p0 = pneg %p873_p13 }
  0x21   : > { %v425_v53 = vld [vmem:[%s273_s29] sm:$0xff] }
  0x22   : > { %770 = vmatpush3.bf16.msra.mxu1 %v860_v19  ;;  %p881_p5 = pnand %p880_p3, %p874_p0 }
  0x23   : > { %771 = vmatprep.subr.bf16.mxu1 %v861_v20 }
  0x26   : > { %772 = vmatpush3.bf16.msra.mxu1 %v862_v21 }
  0x27   : > { %773 = vmatprep.subr.bf16.mxu1 %v863_v22 }
  0x2a   : > { %774 = vmatpush3.bf16.msra.mxu1 %v864_v23 }
  0x2b   : > { %775 = vmatprep.subr.bf16.mxu1 %v865_v24 }
  0x2e   : > { %776 = vmatpush3.bf16.msra.mxu1 %v866_v25 }
  0xf2   : > { %v408_v33 = vpop.f32.mrb[0].mxu0 }
  0xf3   : > { %v409_v34 = vadd.f32 %v408_v33, %v323_v31  ;;  %v410_v35 = vpop.f32.mrb[1].mxu0 }
  0xf4   : > { %v411_v36 = vadd.f32 %v410_v35, %v327_v32  ;;  %v412_v37 = vpop.f32.mrb[2].mxu0 }
  0xf5   : > { %v417_v38 = vmul.f32 0.70710677, %v409_v34  ;;  %v413_v39 = vpop.f32.mrb[3].mxu0  ;;  %v415_v43 = vmul.f32 0.5, %v409_v34 }
  0xf6   : > { %v418_v40 = vmul.f32 0.70710677, %v411_v36  ;;  %v416_v45 = vmul.f32 0.5, %v411_v36 }
  0xf7   : > { %867 = verf.f32 %v417_v38 }
  0xf8   : > { %869 = verf.f32 %v418_v40 }
 0x101   : > { %v868_v41 = vpop.eup %867 }
 0x102   : > { %v870_v42 = vpop.eup %869  ;;  %v421_v44 = vadd.f32 1.0, %v868_v41 }
 0x103   : > { %v422_v46 = vadd.f32 1.0, %v870_v42 }
 0x104   : > { %v423_v47 = vmul.f32 %v421_v44, %v415_v43 }
 0x105   : > { %v424_v48 = vmul.f32 %v422_v46, %v416_v45 }
 0x106   : > { %v426_v50 = vpack.c.bf16 %v423_v47, %v423_v47 }
 0x107   : > { %v427_v49 = vpack.c.bf16 %v424_v48, %v424_v48 }
 0x109   : > { %588 = vmatprep.mubr.bf16.mxu1 %v427_v49 }
 0x10a   : > { %589 = vmatmul.mubr.bf16.vlgmr.msra.gmra.mrb[0].mxu1 %v426_v50 }
 0x1dd   : > { %v777_v52 = vpop.f32.mrb[0].mxu1 }
 0x1de   : > { %v778_v54 = vpop.f32.mrb[1].mxu1 }
 0x1df   : > { %v779_v55 = vadd.f32 %v778_v54, %v777_v52  ;;  %v780_v56 = vpop.f32.mrb[2].mxu1 }
 0x1e0   : > { %v781_v57 = vpop.f32.mrb[3].mxu1 }
 0x1e1   : > { %v596_v58 = vadd.f32 %v779_v55, %v425_v53 }
 0x1e3   : > { %597 = vst.msk [vmem:[%s273_s29] sm:$0xff] %vm307_vm0, %v596_v58 }
 0x1e4   : > { %884 = shalt.err (!%p881_p5)
}
 0x1e5   : > { %s885_s17 = scalar_lea.hbm %s1128_s9, 128  ;;  %s889_s25 = scalar_lea.hbm %s1181_s5, 256 }
 0x1e6   : > { %p886_p6 = scmp.ne.s32.totalorder %s1128_s9, %s885_s17  ;;  %p890_p10 = scmp.lt.u32.totalorder %s1128_s9, %s1181_s5 }
 0x1e7   : > { %p891_p11 = scmp.lt.u32.totalorder %s889_s25, %s885_s17  ;;  %p893_p13 = scmp.lt.u32.totalorder %s885_s17, %s1128_s9 }
 0x1e8   : > { %p887_p7 = pnand %p886_p6, %p1023_p4 }
 0x1e9   : > { %p892_p12 = por %p891_p11, %p890_p10 }
 0x1ea   : > { %p888_p9 = pneg %p887_p7 }
 0x1eb   : > { %p894_p0 = por %p893_p13, %p892_p12 }
 0x1ed   : > { %p895_p1 = pnand %p894_p0, %p888_p9 }
 0x1ef   : > { %898 = shalt.err (!%p895_p1)
}
 0x1f0   : > { %783 = dma.vmem_to_hbm [thread:$0]  (%p1023_p4), %s1130_s8, 128, %s1128_s9, %s599_s12  }
 0x1f1 PF: > { %p789_p2 = scmp.ge.s32.totalorder %s949_s23, 2  ;;  %s624_s7 = sand.u32 1, %s929_s18  }
 0x1f2   : > { %s625_s10 = scalar_lea.sflag [#allocation3], %s624_s7 }
 0x1f3   : > { %p786_p3 = pnand %p789_p2, %p1030_p8 }
 0x1f5   : > { %924 = dma.done.wait (!%p786_p3), %s625_s10, 128  }
 0x1f6   : > { %926 = vsyncadd (!%p786_p3), %s625_s10, 4294967168  ;;  %s18_s23 = sadd.s32 1, %s949_s23   ;;  %s1184_s18 = smov %s933_s19 }
 0x1f7   : > { %p15_p5 = scmp.ge.s32.totalorder %s18_s23, 4   ;;  %s1185_s19 = smov %s937_s20 }
 0x1f8   : > { %s1186_s20 = smov %s1036_s6  ;;  %s1187_s21 = smov %s945_s22 }
 0x1f9   : > { %s1188_s22 = smov %s1190_s26  ;;  %17 = sbr.rel (!%p15_p5) target bundleno = 4 (0x4), region = 88 }
 0x200   :  { %630 = vsyncpa [#allocation3], 1 }
 0x201   :  { %632 = vsyncpa [#allocation3 + $0x1], 1 }

</bundles_post_ra>
